<compile_context>
chip_gen: v6e
topology: v6e:2x2x1
jax: 0.10.0
libtpu: 0.0.40
codegen_flags: <defaults>
</compile_context>

<pallas_src>
import functools

import jax
import jax.numpy as jnp
from jax import lax
from jax.experimental import pallas as pl
from jax.experimental.pallas import tpu as pltpu


# ---------------------------------------------------------------------------
# Pallas kernel: B whole (sample, group) slabs -> group stats + fused affine
# ---------------------------------------------------------------------------
def _adagn_kernel(x_ref, scale_ref, shift_ref, o_ref, *, eps, inv_count):
    B = x_ref.shape[0]
    x = x_ref[...]                                                # (B, Cg, HWp)

    # Single-pass per-slab statistics, accumulated in f32:
    # lane reduction (axis=2) then sublane reduction (axis=1) on the XLU.
    s1 = jnp.sum(x, axis=2, keepdims=True, dtype=jnp.float32)     # (B, Cg, 1)
    s2 = jnp.sum(x * x, axis=2, keepdims=True, dtype=jnp.float32)
    s1 = jnp.sum(s1, axis=1, keepdims=True)                       # (B, 1, 1)
    s2 = jnp.sum(s2, axis=1, keepdims=True)
    mean = s1 * inv_count
    var = jnp.maximum(s2 * inv_count - mean * mean, 0.0)          # clamp one-pass var
    rstd = lax.rsqrt(var + eps)                                   # (B, 1, 1) f32

    # scale/shift are VMEM-resident for the whole grid; slice our B rows.
    off = pl.multiple_of(pl.program_id(0) * B, B)
    scale = scale_ref[pl.ds(off, B), :].astype(jnp.float32)[:, :, None]  # (B, Cg, 1)
    shift = shift_ref[pl.ds(off, B), :].astype(jnp.float32)[:, :, None]  # (B, Cg, 1)

    # Fold mean/rstd/scale/shift into one per-channel (a, b): out = x*a + b.
    a = rstd * scale
    b = shift - mean * a
    if x.dtype == jnp.float32:
        o_ref[...] = (x * a + b).astype(o_ref.dtype)
    else:
        # bf16 apply path: keep the per-element math in the packed input dtype
        # (stats above already accumulated in f32).
        o_ref[...] = (x * a.astype(x.dtype) + b.astype(x.dtype)).astype(o_ref.dtype)


def _pick_batch(n_slabs, slab_bytes, max_block_bytes=2 << 20):
    """Largest divisor B of n_slabs with B*slab_bytes <= ~2 MiB, keeping >=2 steps."""
    best = 1
    for b in range(1, n_slabs + 1):
        if n_slabs % b:
            continue
        if b * slab_bytes > max_block_bytes:
            break
        if n_slabs >= 2 and n_slabs // b < 2:
            continue  # leave at least 2 grid steps so both v7x TensorCores get work
        best = b
    return best


# ---------------------------------------------------------------------------
# Module forward: mapper (tiny plain-JAX glue) + fused group-norm/affine kernel
# ---------------------------------------------------------------------------
def adagn_forward(x_nchw, cond, params, num_groups, eps=1e-5, cond_key="cond"):
    N, C, H, W = x_nchw.shape
    G = num_groups
    assert C % G == 0, "num_groups must divide channels"
    Cg = C // G
    HW = H * W
    n_slabs = N * G

    # mapper: nn.Linear(feats_in, 2*C).  Contract over F without a runtime
    # transpose of the (2C, F) weight; then chunk into (weight, bias).
    c = cond[cond_key]
    ss = lax.dot_general(
        c, params["mapper_w"],
        dimension_numbers=(((1,), (1,)), ((), ())),
        preferred_element_type=jnp.float32) + params["mapper_b"]
    weight, bias = ss[:, :C], ss[:, C:]
    scale = (weight + 1.0).reshape(n_slabs, Cg).astype(jnp.float32)  # fold "+1" here
    shift = bias.reshape(n_slabs, Cg).astype(jnp.float32)

    # Free reshape of contiguous NCHW -> lane-dense (N*G, Cg, H*W); no transposes.
    x = x_nchw.reshape(n_slabs, Cg, HW)

    # Pad HW to a multiple of 128 for unmasked lane-dense loads/stores.  Zero
    # padding does not bias the sums; inv_count below uses the real element count.
    HWp = 128 * pl.cdiv(HW, 128)
    if HWp != HW:
        x = jnp.pad(x, ((0, 0), (0, 0), (0, HWp - HW)))

    itemsize = jnp.dtype(x_nchw.dtype).itemsize
    slab_bytes = Cg * HWp * itemsize
    B = _pick_batch(n_slabs, slab_bytes)
    steps = n_slabs // B
    block_bytes = B * slab_bytes

    # VMEM budget: double-buffered in + out blocks, f32 temps, resident scale/shift.
    resident_bytes = 2 * n_slabs * Cg * 4
    need = 4 * block_bytes + 3 * B * Cg * HWp * 4 + resident_bytes + (1 << 20)
    vmem_limit = int(min(max(need, 32 << 20), 48 << 20))
    # TODO(synk): for huge feature maps where a single (Cg, HW) slab exceeds the
    # block budget (e.g. 256x256 on v7x), split HW into a second grid axis with a
    # two-pass stats-then-apply scheme instead of holding the whole group.

    kernel = functools.partial(
        _adagn_kernel, eps=float(eps), inv_count=1.0 / (Cg * HW))
    out = pl.pallas_call(
        kernel,
        out_shape=jax.ShapeDtypeStruct((n_slabs, Cg, HWp), x_nchw.dtype),
        grid=(steps,),
        in_specs=[
            pl.BlockSpec((B, Cg, HWp), lambda i: (i, 0, 0)),      # x: B full groups
            pl.BlockSpec((n_slabs, Cg), lambda i: (0, 0)),        # resident scale = w+1
            pl.BlockSpec((n_slabs, Cg), lambda i: (0, 0)),        # resident shift = b
        ],
        out_specs=pl.BlockSpec((B, Cg, HWp), lambda i: (i, 0, 0)),
        compiler_params=pltpu.CompilerParams(
            dimension_semantics=("parallel",),
            vmem_limit_bytes=vmem_limit),
    )(x, scale, shift)

    if HWp != HW:
        out = out[:, :, :HW]
    return out.reshape(N, C, H, W)


# ---------------------------------------------------------------------------
# Pure-JAX reference (matches F.group_norm + addcmul semantics)
# ---------------------------------------------------------------------------
def adagn_reference(x, cond, params, num_groups, eps=1e-5, cond_key="cond"):
    N, C, H, W = x.shape
    c = cond[cond_key]
    ss = jnp.dot(c, params["mapper_w"].T) + params["mapper_b"]
    weight, bias = ss[:, :C], ss[:, C:]
    xg = x.reshape(N, num_groups, -1)
    mean = jnp.mean(xg, axis=-1, keepdims=True)
    var = jnp.var(xg, axis=-1, keepdims=True)
    xn = ((xg - mean) / jnp.sqrt(var + eps)).reshape(N, C, H, W)
    return bias[:, :, None, None] + xn * (weight[:, :, None, None] + 1.0)


if __name__ == "__main__":
    N, C, H, W = 2, 4, 16, 16
    feats_in, num_groups, eps = 8, 2, 1e-5

    key = jax.random.PRNGKey(0)
    kx, kc, kw, kb = jax.random.split(key, 4)
    x = jax.random.normal(kx, (N, C, H, W), jnp.float32)
    cond = {"cond": jax.random.normal(kc, (N, feats_in), jnp.float32)}
    params = {
        "mapper_w": jax.random.normal(kw, (2 * C, feats_in), jnp.float32) * 0.1,
        "mapper_b": jax.random.normal(kb, (2 * C,), jnp.float32) * 0.1,
    }

    out = adagn_forward(x, cond, params, num_groups, eps)
    out = jax.block_until_ready(out)

    ref = adagn_reference(x, cond, params, num_groups, eps)
    assert out.shape == (N, C, H, W)
    assert jnp.allclose(out, ref, rtol=1e-5, atol=1e-5), "mismatch vs reference"
    print("KERNEL_OK")
</pallas_src>

<mosaic_0001>
module attributes {stable_mosaic.version = 11 : i64} {
  func.func @_adagn_kernel(%arg0: i32, %arg1: memref<2x2x256xf32, #tpu.memory_space<vmem>>, %arg2: memref<4x2xf32, #tpu.memory_space<vmem>>, %arg3: memref<4x2xf32, #tpu.memory_space<vmem>>, %arg4: memref<2x2x256xf32, #tpu.memory_space<vmem>>) attributes {dimension_semantics = [#tpu.dimension_semantics<parallel>], iteration_bounds = array<i64: 2>, scalar_prefetch = 0 : i64, scratch_operands = 0 : i64, tpu.core_type = #tpu.core_type<tc>, window_params = [{transform_indices = @transform_0, window_bounds = array<i64: 2, 2, 256>}, {pipeline_mode = #tpu.pipeline_mode<synchronous>, transform_indices = @transform_1, window_bounds = array<i64: 4, 2>}, {pipeline_mode = #tpu.pipeline_mode<synchronous>, transform_indices = @transform_2, window_bounds = array<i64: 4, 2>}, {transform_indices = @transform_3, window_bounds = array<i64: 2, 2, 256>}]} {
    %c0 = arith.constant 0 : index
    %c0_0 = arith.constant 0 : index
    %c0_1 = arith.constant 0 : index
    %0 = vector.load %arg1[%c0, %c0_0, %c0_1] : memref<2x2x256xf32, #tpu.memory_space<vmem>>, vector<2x2x256xf32>
    %cst = arith.constant dense<0.000000e+00> : vector<2x2xf32>
    %1 = vector.multi_reduction <add>, %0, %cst [2] : vector<2x2x256xf32> to vector<2x2xf32>
    %2 = vector.shape_cast %1 : vector<2x2xf32> to vector<2x2x1xf32>
    %3 = arith.mulf %0, %0 : vector<2x2x256xf32>
    %cst_2 = arith.constant dense<0.000000e+00> : vector<2x2xf32>
    %4 = vector.multi_reduction <add>, %3, %cst_2 [2] : vector<2x2x256xf32> to vector<2x2xf32>
    %5 = vector.shape_cast %4 : vector<2x2xf32> to vector<2x2x1xf32>
    %cst_3 = arith.constant dense<0.000000e+00> : vector<2x1xf32>
    %6 = vector.multi_reduction <add>, %2, %cst_3 [1] : vector<2x2x1xf32> to vector<2x1xf32>
    %7 = vector.shape_cast %6 : vector<2x1xf32> to vector<2x1x1xf32>
    %cst_4 = arith.constant dense<0.000000e+00> : vector<2x1xf32>
    %8 = vector.multi_reduction <add>, %5, %cst_4 [1] : vector<2x2x1xf32> to vector<2x1xf32>
    %9 = vector.shape_cast %8 : vector<2x1xf32> to vector<2x1x1xf32>
    %cst_5 = arith.constant 0.001953125 : f32
    %10 = vector.broadcast %cst_5 : f32 to vector<2x1x1xf32>
    %11 = arith.mulf %7, %10 : vector<2x1x1xf32>
    %cst_6 = arith.constant 0.001953125 : f32
    %12 = vector.broadcast %cst_6 : f32 to vector<2x1x1xf32>
    %13 = arith.mulf %9, %12 : vector<2x1x1xf32>
    %14 = arith.mulf %11, %11 : vector<2x1x1xf32>
    %15 = arith.subf %13, %14 : vector<2x1x1xf32>
    %cst_7 = arith.constant 0.000000e+00 : f32
    %16 = vector.broadcast %cst_7 : f32 to vector<2x1x1xf32>
    %17 = arith.maximumf %15, %16 : vector<2x1x1xf32>
    %cst_8 = arith.constant 9.99999974E-6 : f32
    %18 = vector.broadcast %cst_8 : f32 to vector<2x1x1xf32>
    %19 = arith.addf %17, %18 : vector<2x1x1xf32>
    %20 = math.rsqrt %19 : vector<2x1x1xf32>
    %c2_i32 = arith.constant 2 : i32
    %21 = arith.muli %arg0, %c2_i32 : i32
    %22 = tpu.assume_multiple %21, 2 : i32
    %23 = arith.index_cast %22 : i32 to index
    %c0_9 = arith.constant 0 : index
    %24 = vector.load %arg2[%23, %c0_9] : memref<4x2xf32, #tpu.memory_space<vmem>>, vector<2x2xf32>
    %25 = vector.shape_cast %24 : vector<2x2xf32> to vector<2x2x1xf32>
    %26 = arith.index_cast %22 : i32 to index
    %c0_10 = arith.constant 0 : index
    %27 = vector.load %arg3[%26, %c0_10] : memref<4x2xf32, #tpu.memory_space<vmem>>, vector<2x2xf32>
    %28 = vector.shape_cast %27 : vector<2x2xf32> to vector<2x2x1xf32>
    %29 = vector.broadcast %20 : vector<2x1x1xf32> to vector<2x2x1xf32>
    %30 = arith.mulf %29, %25 : vector<2x2x1xf32>
    %31 = vector.broadcast %11 : vector<2x1x1xf32> to vector<2x2x1xf32>
    %32 = arith.mulf %31, %30 : vector<2x2x1xf32>
    %33 = arith.subf %28, %32 : vector<2x2x1xf32>
    %34 = vector.broadcast %30 : vector<2x2x1xf32> to vector<2x2x256xf32>
    %35 = arith.mulf %0, %34 : vector<2x2x256xf32>
    %36 = vector.broadcast %33 : vector<2x2x1xf32> to vector<2x2x256xf32>
    %37 = arith.addf %35, %36 : vector<2x2x256xf32>
    %c0_11 = arith.constant 0 : index
    %c0_12 = arith.constant 0 : index
    %c0_13 = arith.constant 0 : index
    %38 = vector.load %arg4[%c0_11, %c0_12, %c0_13] : memref<2x2x256xf32, #tpu.memory_space<vmem>>, vector<2x2x256xf32>
    tpu.vector_store %arg4[%c0_11, %c0_12, %c0_13], %37 {strides = array<i32>} : memref<2x2x256xf32, #tpu.memory_space<vmem>>, vector<2x2x256xf32>,
    return
  }
  func.func @transform_0(%arg0: i32) -> (i32, i32, i32) {
    %c0_i32 = arith.constant 0 : i32
    %c0_i32_0 = arith.constant 0 : i32
    %c0_i32_1 = arith.constant 0 : i32
    return %arg0, %c0_i32, %c0_i32_0 : i32, i32, i32
  }
  func.func @transform_1(%arg0: i32) -> (i32, i32) {
    %c0_i32 = arith.constant 0 : i32
    %c0_i32_0 = arith.constant 0 : i32
    %c0_i32_1 = arith.constant 0 : i32
    return %c0_i32, %c0_i32_0 : i32, i32
  }
  func.func @transform_2(%arg0: i32) -> (i32, i32) {
    %c0_i32 = arith.constant 0 : i32
    %c0_i32_0 = arith.constant 0 : i32
    %c0_i32_1 = arith.constant 0 : i32
    return %c0_i32, %c0_i32_0 : i32, i32
  }
  func.func @transform_3(%arg0: i32) -> (i32, i32, i32) {
    %c0_i32 = arith.constant 0 : i32
    %c0_i32_0 = arith.constant 0 : i32
    %c0_i32_1 = arith.constant 0 : i32
    return %arg0, %c0_i32, %c0_i32_0 : i32, i32, i32
  }
}

</mosaic_0001>

<bundles_post_ra>
// kernel: tpu_custom_call.1
= control target key start
LH: loop header
LB: loop body
LE: loop exit
PB: predicated region body
PF: predicated region fallthrough
CT: control target
= control target key end

     0   :  { %8 = vsyncpa [#allocation3], 0  ;;  %s870_s0 = inlined_call_operand.hbm [shape: f32[4,2,256], index: 0, kind: input, shape index: {}]   ;;  %s871_s1 = inlined_call_operand.vmem [shape: f32[4,2], index: 1, kind: input, shape index: {}]   ;;  %s872_s2 = inlined_call_operand.vmem [shape: f32[4,2], index: 2, kind: input, shape index: {}]   ;;  %s873_s3 = inlined_call_operand.hbm [shape: f32[4,2,256], index: 3, kind: output, shape index: {}]  }
   0x1   :  { %10 = vsyncpa [#allocation3 + $0x1], 0 }
   0x2   :  { %11 = vsyncpa [#allocation4], 0 }
   0x3   :  { %13 = vsyncpa [#allocation4 + $0x1], 0  ;;  %s675_s12 = smov 0   ;;  %s677_s13 = smov 0  }
   0x4   :  { %s679_s14 = smov 0   ;;  %s681_s15 = smov 0  }
   0x5 LB: > { %s696_s16 = sadd.s32 4294967295, %s645_s15   ;;  %s476_s17 = sadd.s32 4294967294, %s645_s15   ;;  %s645_s15 = sphi %s681_s15, %s888_s15   ;;  %s641_s14 = sphi %s679_s14, %s887_s14   ;;  %s637_s13 = sphi %s677_s13, %s886_s13   ;;  %s633_s12 = sphi %s675_s12, %s885_s12  }
   0x6   : > { %s700_s18 = sadd.s32 1, %s645_s15   ;;  %s26_s19 = sadd.s32 1, %s641_s14 }
   0x7   : > { %s23_s20 = ssub.s32 %s645_s15, %s700_s18  ;;  %p33_p0 = scmp.ne.s32.totalorder %s641_s14, %s637_s13 }
   0x8   : > { %p24_p1 = scmp.eq.s32.totalorder %s23_s20, 0  ;;  %p34_p2 = scmp.eq.s32.totalorder %s645_s15, 0 }
   0x9   : > { %p39_p3 = scmp.ne.s32.totalorder %s637_s13, %s633_s12  ;;  %p40_p4 = scmp.eq.s32.totalorder %s696_s16, 0 }
   0xa   : > { %s712_s21 = scalar_select %p24_p1, %s641_s14, %s26_s19  }
   0xb   : > { %p714_p5 = por %p34_p2, %p33_p0  ;;  %p718_p6 = por %p40_p4, %p39_p3 }
   0xc   : > { %p105_p7 = scmp.eq.s32.totalorder %s696_s16, 1  ;;  %p111_p8 = scmp.eq.s32.totalorder %s476_s17, 1 }
   0xd   : > { %s877_s23 = scalar_select %p718_p6, 1, 0 }
   0xe   : > { %p509_p10 = scmp.lt.s32.totalorder %s645_s15, 2  ;;  %p725_p11 = por %p105_p7, %p33_p0 }
   0xf   : > { %p729_p12 = por %p111_p8, %p39_p3  ;;  %s137_s26 = sand.u32 1, %s641_s14  }
  0x10   : > { %s878_s24 = scalar_select %p725_p11, 1, 0 }
  0x11   : > { %s879_s25 = scalar_select %p729_p12, 1, 0 }
  0x12   : > { %s494_s27 = sshll.u32 %s645_s15, 7  ;;  %s479_s28 = sshll.u32 %s137_s26, 3 }
  0x13   : > { %s738_s4 = scalar_lea.hbm %s870_s0, %s494_s27  ;;  %s141_s5 = scalar_lea.vmem [#allocation2], %s479_s28 }
  0x14   : > { %s149_s6 = sshll.u32 %s141_s5, 4  ;;  %p742_p13 = pnand %p509_p10, %p714_p5  ;;  %s746_s6 = int_to_ptr.vmem [resolvable:$true] %s149_s6 }
  0x15   : > { %s748_s8 = scalar_lea.sflag [#allocation3], %s137_s26  ;;  %s553_s9 = scalar_lea.hbm %s738_s4, 128 }
  0x16   : > { %p554_p0 = scmp.ne.s32.totalorder %s738_s4, %s553_s9  ;;  %p555_p1 = pneg %p742_p13 }
  0x17   : > { %s558_s17 = scalar_lea.hbm %s870_s0, 256  ;;  %p559_p4 = scmp.lt.s32.totalorder %s738_s4, %s870_s0 }
  0x18   : > { %p556_p2 = pnand %p555_p1, %p554_p0  ;;  %p560_p5 = scmp.lt.s32.totalorder %s558_s17, %s553_s9 }
  0x1a   : > { %p557_p3 = pneg %p556_p2  ;;  %p561_p7 = por %p560_p5, %p559_p4 }
  0x1c   : > { %p562_p8 = pnand %p561_p7, %p557_p3 }
  0x1e   : > { %565 = shalt.err (!%p562_p8)
}
  0x1f   : > { %s566_s22 = scalar_lea.vmem %s746_s6, 128  ;;  %s647_s26 = smov [#allocation2]  }
  0x20   : > { %p567_p10 = scmp.ne.s32.totalorder %s746_s6, %s566_s22  ;;  %s571_s27 = sshll.u32 %s647_s26, 4  ;;  %s572_s27 = int_to_ptr.vmem [resolvable:$false] %s571_s27 }
  0x21   : > { %s573_s28 = scalar_lea.vmem %s572_s27, 256  ;;  %p574_p2 = scmp.lt.s32.totalorder %s746_s6, %s572_s27 }
  0x22   : > { %p569_p9 = pnand %p567_p10, %p555_p1  ;;  %p575_p12 = scmp.lt.s32.totalorder %s573_s28, %s566_s22 }
  0x24   : > { %p570_p0 = pneg %p569_p9  ;;  %p576_p11 = por %p575_p12, %p574_p2 }
  0x26   : > { %p577_p6 = pnand %p576_p11, %p570_p0 }
  0x28   : > { %580 = shalt.err (!%p577_p6)
}
  0x29   : > { %s648_s29 = smov 64   ;;  %s649_s30 = smov 4  }
  0x2a   : > { %504 = dma.hbm_to_vmem [thread:$0]  (!%p742_p13), %s738_s4, 128, %s746_s6, %s748_s8, %s648_s29, %s648_s29, %s649_s30  }
  0x2b   : > { %p483_p9 = scmp.ge.s32.totalorder %s645_s15, 1  ;;  %p157_p1 = scmp.lt.s32.totalorder %s645_s15, 3 }
  0x2d   : > { %p158_p3 = pnand %p483_p9, %p157_p1 }
  0x2e   : > { %s772_s5 = sand.u32 (!%p158_p3), 1, %s637_s13   ;;  %p881_p6 = scmp.ne.s32.totalorder (!%p158_p3), %s877_s23, 0 }
  0x2f   : > { %161 = sbr.rel (%p158_p3) target bundleno = 270 (0x10e), region = 32  ;;  %s484_s9 = sshll.u32 (!%p158_p3), %s772_s5, 3 }
  0x30   : > { %s164_s10 = scalar_lea.sflag (!%p158_p3), [#allocation3], %s772_s5  ;;  %s167_s11 = scalar_lea.vmem (!%p158_p3), [#allocation2], %s484_s9 }
  0x34   : > { %624 = dma.done.wait (%p881_p6), %s164_s10, 128  }
  0x35   : > { %626 = vsyncadd (%p881_p6), %s164_s10, 4294967168  ;;  %v199_v0 = vlaneseq  ;;  %v650_v1 = vmov 1983009808   ;;  %v785_v6 = vld [vmem:[%s167_s11] sm:$0xf]  ;;  %vm216_vm0 = vcmask 1041408  }
  0x36   : > { %v197_v2 = vunpack.c.l.s4 %v650_v1  ;;  %v787_v7 = vld [vmem:[%s167_s11 + $0x4] sm:$0xf]  ;;  %v227_v9 = vmul.f32 %v785_v6, %v785_v6  ;;  %s486_s23 = sshll.u32 %s696_s16, 1  ;;  %s189_s20 = scalar_lea.vmem [#allocation5], %s484_s9 }
  0x37   : > { %v782_v3 = vshrl.u32 %v199_v0, 7  ;;  %v228_v11 = vmul.f32 %v787_v7, %v787_v7  ;;  %s304_s7 = scalar_lea.vmem %s871_s1, %s486_s23  ;;  %s320_s19 = scalar_lea.vmem %s872_s2, %s486_s23 }
  0x38   : > { %v198_v4 = vunpack.c.0.s8 %v197_v2  ;;  %v305_v31 = vld [vmem:[%s304_s7] sm:$0x3]  ;;  %s399_s22 = sshll.u32 %s189_s20, 4  ;;  %s496_s26 = sshll.u32 %s696_s16, 7  ;;  %s822_s22 = int_to_ptr.vmem [resolvable:$true] %s399_s22 }
  0x39   : > { %v315_v30 = vsub.s32 1, %v782_v3  ;;  %v308_v32 = vsub.s32 0, %v782_v3  ;;  %v321_v34 = vld [vmem:[%s320_s19] sm:$0x3]  ;;  %s827_s29 = scalar_lea.hbm %s873_s3, %s496_s26  ;;  %s385_s30 = scalar_lea.sflag [#allocation4], %s772_s5 }
  0x3a   : > { %v201_v5 = vsub.s32 %v198_v4, %v782_v3  ;;  %s581_s9 = scalar_lea.vmem %s822_s22, 128  ;;  %p882_p12 = scmp.ne.s32.totalorder %s878_s24, 0 }
  0x3b   : > { %v316_v33 = vrot.slane %v305_v31, %v315_v30  ;;  %v309_v35 = vrot.slane %v305_v31, %v308_v32  ;;  %v325_v36 = vrot.slane %v321_v34, %v308_v32  ;;  %v332_v37 = vrot.slane %v321_v34, %v315_v30  ;;  %p582_p11 = scmp.ne.s32.totalorder %s822_s22, %s581_s9  ;;  %s652_s16 = smov [#allocation5]  }
  0x3c   : > { %v202_v8 = vrot.slane %v785_v6, %v201_v5  ;;  %v210_v10 = vrot.slane %v787_v7, %v201_v5  ;;  %v237_v14 = vrot.slane %v227_v9, %v201_v5  ;;  %v245_v17 = vrot.slane %v228_v11, %v201_v5  ;;  %s585_s10 = sshll.u32 %s652_s16, 4  ;;  %s586_s10 = int_to_ptr.vmem [resolvable:$false] %s585_s10 }
  0x3d   : > { %p583_p13 = pnand %p582_p11, %p882_p12  ;;  %s587_s11 = scalar_lea.vmem %s586_s10, 256 }
  0x3e   : > { %v203_v12 = vcombine.high %v202_v8, %v202_v8  ;;  %v217_v13 = vsel %vm216_vm0, %v202_v8, 0.0  ;;  %v211_v15 = vcombine.high %v210_v10, %v210_v10  ;;  %v222_v16 = vsel %vm216_vm0, %v210_v10, 0.0  ;;  %p588_p5 = scmp.lt.s32.totalorder %s822_s22, %s586_s10  ;;  %p589_p7 = scmp.lt.s32.totalorder %s587_s11, %s581_s9 }
  0x3f   : > { %v238_v19 = vcombine.high %v237_v14, %v237_v14  ;;  %v251_v20 = vsel %vm216_vm0, %v237_v14, 0.0  ;;  %v246_v23 = vcombine.high %v245_v17, %v245_v17  ;;  %v256_v25 = vsel %vm216_vm0, %v245_v17, 0.0  ;;  %p584_p4 = pneg %p583_p13 }
  0x40   : > { %v218_v18 = vsel %vm216_vm0, %v203_v12, 0.0  ;;  %v223_v21 = vsel %vm216_vm0, %v211_v15, 0.0  ;;  %p590_p8 = por %p589_p7, %p588_p5 }
  0x41   : > { %v219_v22 = vadd.f32 %v218_v18, %v217_v13  ;;  %v252_v24 = vsel %vm216_vm0, %v238_v19, 0.0  ;;  %v224_v27 = vadd.f32 %v223_v21, %v222_v16  ;;  %v257_v28 = vsel %vm216_vm0, %v246_v23, 0.0 }
  0x42   : > { %v253_v26 = vadd.f32 %v252_v24, %v251_v20  ;;  %v258_v29 = vadd.f32 %v257_v28, %v256_v25  ;;  %v651_v21 = vmov 269488144   ;;  %p591_p10 = pnand %p590_p8, %p584_p4 }
  0x43   : > { %220 = vadd.xlane.f32.xlu0 %v219_v22  ;;  %v345_v22 = vunpack.c.l.s4 %v651_v21 }
  0x44   : > { %254 = vadd.xlane.f32.xlu1 %v253_v26 }
  0x45   : > { %v346_v24 = vunpack.c.0.s8 %v345_v22 }
  0x47   : > { %225 = vadd.xlane.f32.xlu0 %v224_v27  ;;  %v349_v26 = vsub.s32 %v346_v24, %v782_v3 }
  0x48   : > { %259 = vadd.xlane.f32.xlu1 %v258_v29 }
  0x59   : > { %318 = vbcast.lane.b32.xlu1 %v316_v33, 256 }
  0x5d   : > { %311 = vbcast.lane.b32.xlu0 %v309_v35, 256  ;;  %327 = vbcast.lane.b32.xlu1 %v325_v36, 256 }
  0x61   : > { %334 = vbcast.lane.b32.xlu1 %v332_v37, 256 }
  0xcc   : > { %v221_v38 = vpop.xlane.xlu0 %220 }
  0xcd   : > { %v261_v39 = vsel %vm216_vm0, %v221_v38, 0.0  ;;  %v255_v41 = vpop.xlane.xlu1 %254 }
  0xce   : > { %v262_v40 = vrot.slane %v261_v39, 4  ;;  %v275_v42 = vsel %vm216_vm0, %v255_v41, 0.0 }
  0xcf   : > { %v276_v44 = vrot.slane %v275_v42, 4 }
  0xd0   : > { %v263_v43 = vadd.f32 %v262_v40, %v261_v39  ;;  %v226_v45 = vpop.xlane.xlu0 %225 }
  0xd1   : > { %v268_v46 = vsel %vm216_vm0, %v226_v45, 0.0  ;;  %v277_v48 = vadd.f32 %v276_v44, %v275_v42  ;;  %v260_v50 = vpop.xlane.xlu1 %259 }
  0xd2   : > { %v264_v47 = vrot.slane %v263_v43, 2  ;;  %v269_v49 = vrot.slane %v268_v46, 4  ;;  %v282_v51 = vsel %vm216_vm0, %v260_v50, 0.0 }
  0xd3   : > { %v278_v53 = vrot.slane %v277_v48, 2  ;;  %v283_v55 = vrot.slane %v282_v51, 4 }
  0xd4   : > { %v265_v52 = vadd.f32 %v264_v47, %v263_v43  ;;  %v270_v54 = vadd.f32 %v269_v49, %v268_v46  ;;  %v312_v25 = vpop.permute.xlu0 %311 }
  0xd5   : > { %v279_v57 = vadd.f32 %v278_v53, %v277_v48  ;;  %v284_v59 = vadd.f32 %v283_v55, %v282_v51  ;;  %v319_v23 = vpop.permute.xlu1 %318 }
  0xd6   : > { %v266_v56 = vrot.slane %v265_v52, 1  ;;  %v271_v58 = vrot.slane %v270_v54, 2 }
  0xd7   : > { %v280_v61 = vrot.slane %v279_v57, 1  ;;  %v285_v63 = vrot.slane %v284_v59, 2 }
  0xd8   : > { %v267_v60 = vadd.f32 %v266_v56, %v265_v52  ;;  %v272_v62 = vadd.f32 %v271_v58, %v270_v54 }
  0xd9   : > { %v281_v1 = vadd.f32 %v280_v61, %v279_v57  ;;  %v286_v4 = vadd.f32 %v285_v63, %v284_v59  ;;  %v328_v28 = vpop.permute.xlu1 %327 }
  0xda   : > { %v289_v0 = vmul.f32 0.001953125, %v267_v60  ;;  %v273_v2 = vrot.slane %v272_v62, 1 }
  0xdb   : > { %v291_v8 = vmul.f32 0.001953125, %v281_v1  ;;  %v287_v10 = vrot.slane %v286_v4, 1 }
  0xdc   : > { %v293_v5 = vmul.f32 %v289_v0, %v289_v0  ;;  %v274_v9 = vadd.f32 %v273_v2, %v272_v62 }
  0xdd   : > { %v288_v13 = vadd.f32 %v287_v10, %v286_v4  ;;  %v335_v35 = vpop.permute.xlu1 %334 }
  0xde   : > { %v295_v11 = vsub.f32 %v291_v8, %v293_v5  ;;  %v290_v12 = vmul.f32 0.001953125, %v274_v9 }
  0xdf   : > { %v292_v16 = vmul.f32 0.001953125, %v288_v13 }
  0xe0   : > { %v297_v14 = vmax.f32 %v295_v11, 0.0  ;;  %v294_v15 = vmul.f32 %v290_v12, %v290_v12 }
  0xe2   : > { %v299_v17 = vadd.f32 1e-05, %v297_v14  ;;  %v296_v18 = vsub.f32 %v292_v16, %v294_v15 }
  0xe4   : > { %549 = vrsqrt.f32 %v299_v17  ;;  %v298_v19 = vmax.f32 %v296_v18, 0.0 }
  0xe6   : > { %v300_v20 = vadd.f32 1e-05, %v298_v19 }
  0xe8   : > { %551 = vrsqrt.f32 %v300_v20 }
  0xf1   : > { %v550_v27 = vpop.eup %549 }
  0xf2   : > { %v336_v29 = vmul.f32 %v550_v27, %v312_v25 }
  0xf4   : > { %v350_v30 = vrot.slane %v336_v29, %v349_v26  ;;  %v338_v31 = vmul.f32 %v336_v29, %v289_v0 }
  0xf5   : > { %v552_v32 = vpop.eup %551 }
  0xf6   : > { %v337_v33 = vmul.f32 %v552_v32, %v319_v23  ;;  %v340_v34 = vsub.f32 %v328_v28, %v338_v31  ;;  %v360_v37 = vmul.f32 %v350_v30, %v785_v6 }
  0xf8   : > { %v357_v36 = vrot.slane %v337_v33, %v349_v26  ;;  %v370_v38 = vrot.slane %v340_v34, %v349_v26  ;;  %v339_v39 = vmul.f32 %v337_v33, %v290_v12 }
  0xfa   : > { %v380_v3 = vadd.f32 %v370_v38, %v360_v37  ;;  %v341_v40 = vsub.f32 %v335_v35, %v339_v39  ;;  %v361_v41 = vmul.f32 %v357_v36, %v787_v7 }
  0xfc   : > { %382 = vst [vmem:[%s189_s20] sm:$0xf] %v380_v3  ;;  %v377_v42 = vrot.slane %v341_v40, %v349_v26 }
  0xfe   : > { %v381_v6 = vadd.f32 %v377_v42, %v361_v41 }
 0x100   : > { %383 = vst [vmem:[%s189_s20 + $0x4] sm:$0xf] %v381_v6 }
 0x101   : > { %594 = shalt.err (!%p591_p10)
}
 0x102   : > { %s595_s23 = scalar_lea.hbm %s827_s29, 128  ;;  %s599_s7 = scalar_lea.hbm %s873_s3, 256 }
 0x103   : > { %p596_p0 = scmp.ne.s32.totalorder %s827_s29, %s595_s23  ;;  %p600_p1 = scmp.lt.s32.totalorder %s827_s29, %s873_s3 }
 0x104   : > { %p601_p3 = scmp.lt.s32.totalorder %s599_s7, %s595_s23 }
 0x105   : > { %p597_p2 = pnand %p596_p0, %p882_p12 }
 0x106   : > { %p602_p6 = por %p601_p3, %p600_p1 }
 0x107   : > { %p598_p9 = pneg %p597_p2 }
 0x109   : > { %p603_p11 = pnand %p602_p6, %p598_p9 }
 0x10b   : > { %606 = shalt.err (!%p603_p11)
}
 0x10c   : > { %s653_s19 = smov 64   ;;  %s654_s20 = smov 4  }
 0x10d   : > { %499 = dma.vmem_to_hbm [thread:$0]  (%p882_p12), %s822_s22, 128, %s827_s29, %s385_s30, %s653_s19, %s653_s19, %s654_s20  }
 0x10e PF: > { %s414_s26 = sand.u32 1, %s633_s12   ;;  %p883_p13 = scmp.ne.s32.totalorder %s879_s25, 0 }
 0x10f   : > { %p884_p4 = scmp.ge.s32.totalorder %s645_s15, 2  ;;  %s415_s27 = scalar_lea.sflag [#allocation4], %s414_s26 }
 0x111   : > { %p506_p5 = pnand %p884_p4, %p883_p13 }
 0x113   : > { %p507_p7 = pneg %p506_p5 }
 0x115   : > { %628 = dma.done.wait (%p507_p7), %s415_s27, 128  }
 0x116   : > { %630 = vsyncadd (%p507_p7), %s415_s27, 4294967168  ;;  %p16_p8 = scmp.ge.s32.totalorder %s700_s18, 4   ;;  %s885_s12 = smov %s637_s13 }
 0x117   : > { %s886_s13 = smov %s641_s14  ;;  %s887_s14 = smov %s712_s21 }
 0x118   : > { %s888_s15 = smov %s700_s18  ;;  %18 = sbr.rel (!%p16_p8) target bundleno = 5 (0x5), region = 79 }
 0x11d   :  { %420 = vsyncpa [#allocation3], 1 }
 0x11e   :  { %422 = vsyncpa [#allocation3 + $0x1], 1 }
 0x11f   :  { %423 = vsyncpa [#allocation4], 1 }
 0x120   :  { %425 = vsyncpa [#allocation4 + $0x1], 1 }

</bundles_post_ra>
